<compile_context>
chip_gen: v5e
topology: v5e:2x2
jax: 0.10.0
libtpu: 0.0.40
codegen_flags: <defaults>
</compile_context>

<pallas_src>
import functools

import jax
import jax.numpy as jnp
import numpy as np
from jax.experimental import pallas as pl
from jax.experimental.pallas import tpu as pltpu


def _round_up(x: int, m: int) -> int:
    return ((x + m - 1) // m) * m


# ------------------------------ Pallas kernel -------------------------------

def _conv_kernel(a_ref, w_ref, b_ref, o_ref, *, tap_shifts, tile_q, compute_dtype):
    """One (sample, q-tile) grid step.

    a_ref: (a_rows, K)       flattened, lane-packed padded sample (resident across q)
    w_ref: (n_taps, K, Cp)   one (K, Cp) weight slab per remaining row-tap
    b_ref: (1, Cp)           fp32 bias row
    o_ref: (tile_q, Cp)      lane-dense fp32 output tile
    """
    q0 = pl.multiple_of(pl.program_id(1) * tile_q, 8)
    cout_p = o_ref.shape[-1]

    # Start the accumulator at the broadcast bias (saves a separate add).
    acc = jnp.broadcast_to(b_ref[...].astype(jnp.float32), (tile_q, cout_p))

    # Static (unrolled) loop over remaining taps: each tap is a shifted
    # row-window of the resident input -> one MXU dot, fp32 accumulation.
    for t, shift in enumerate(tap_shifts):
        a_blk = a_ref[pl.ds(q0 + shift, tile_q), :].astype(compute_dtype)
        acc = acc + jnp.dot(a_blk, w_ref[t], preferred_element_type=jnp.float32)

    o_ref[...] = acc.astype(o_ref.dtype)


# ------------------------------ conv wrapper --------------------------------

def conv2d_pallas(x_nhwc, w_hwio, bias, *, tile_q=256,
                  compute_dtype=jnp.bfloat16, pack_lane_limit=128):
    """Conv2d, stride=1, padding=(kw-1)//2, with bias.  NHWC in / NHWC out."""
    N, H, W, Cin = x_nhwc.shape
    kh, kw, wc_in, Cout = w_hwio.shape
    assert wc_in == Cin and kh == kw

    pad = (kw - 1) // 2                     # nn.Conv2d padding used by the module
    Hp, Wp = H + 2 * pad, W + 2 * pad
    Ho, Wo = Hp - kh + 1, Wp - kw + 1

    # Outputs laid on an (Ho, Wp) grid (trailing 2*pad cols per row are junk,
    # sliced off afterwards): tap (di, dj) reads flat row q + di*Wp + dj.
    mq = Ho * Wp
    tile_q = max(8, min(_round_up(tile_q, 8), _round_up(mq, 8)))
    mq_pad = _round_up(mq, tile_q)
    n_q = mq_pad // tile_q

    # --- choose how many taps fold into the lane (K) axis --------------------
    if kh * kw * Cin <= pack_lane_limit:
        lane_shifts = [di * Wp + dj for di in range(kh) for dj in range(kw)]
        tap_shifts = (0,)                                   # one deep-K dot
        w_mat = w_hwio.reshape(1, kh * kw * Cin, Cout)
    elif kw * Cin <= pack_lane_limit:
        lane_shifts = list(range(kw))                       # pack one kernel row
        tap_shifts = tuple(di * Wp for di in range(kh))
        w_mat = w_hwio.reshape(kh, kw * Cin, Cout)
    else:
        lane_shifts = [0]                                   # Cin already deep
        tap_shifts = tuple(di * Wp + dj for di in range(kh) for dj in range(kw))
        w_mat = w_hwio.reshape(kh * kw, Cin, Cout)

    n_taps, K, _ = w_mat.shape
    s_max = max(tap_shifts)
    a_rows = _round_up(mq_pad + s_max, 8)

    # --- build the lane-packed flat-q activation (read from HBM once) --------
    xp = jnp.pad(x_nhwc, ((0, 0), (pad, pad), (pad, pad), (0, 0)))
    flat = xp.reshape(N, Hp * Wp, Cin)
    need = a_rows + max(lane_shifts)
    flat = jnp.pad(flat, ((0, 0), (0, need - Hp * Wp), (0, 0)))   # zero tail
    pieces = [flat[:, s:s + a_rows, :] for s in lane_shifts]
    a = pieces[0] if len(pieces) == 1 else jnp.concatenate(pieces, axis=-1)

    # --- lane-dense output: pad Cout up to a multiple of 128 ------------------
    cout_p = _round_up(Cout, 128)
    w_mat = jnp.pad(w_mat, ((0, 0), (0, 0), (0, cout_p - Cout))).astype(compute_dtype)
    b_row = jnp.pad(bias.astype(jnp.float32), (0, cout_p - Cout)).reshape(1, cout_p)

    kernel = functools.partial(_conv_kernel, tap_shifts=tap_shifts,
                               tile_q=tile_q, compute_dtype=compute_dtype)

    flops = 2 * N * mq_pad * (kh * kw * Cin) * cout_p
    bytes_accessed = (int(a.size) * a.dtype.itemsize
                      + int(w_mat.size) * w_mat.dtype.itemsize
                      + int(b_row.size) * 4
                      + N * mq_pad * cout_p * 4)

    vmem_need = (2 * a_rows * _round_up(K, 128) * a.dtype.itemsize          # resident input (dbl-buf)
                 + 2 * n_taps * _round_up(K, 8) * cout_p * w_mat.dtype.itemsize
                 + 2 * 8 * cout_p * 4
                 + 3 * tile_q * cout_p * 4)                                 # out tiles + acc headroom
    vmem_limit = min(100 * 1024 * 1024, max(32 * 1024 * 1024, int(1.3 * vmem_need)))

    out_flat = pl.pallas_call(
        kernel,
        out_shape=jax.ShapeDtypeStruct((N, mq_pad, cout_p), jnp.float32),
        grid=(N, n_q),
        in_specs=[
            # Full flattened sample, resident in VMEM across all q tiles.
            pl.BlockSpec((None, a_rows, K), lambda n, q: (n, 0, 0)),
            # All weights / bias resident (few KB; fetched once).
            pl.BlockSpec((n_taps, K, cout_p), lambda n, q: (0, 0, 0)),
            pl.BlockSpec((1, cout_p), lambda n, q: (0, 0)),
        ],
        out_specs=pl.BlockSpec((None, tile_q, cout_p), lambda n, q: (n, q, 0)),
        compiler_params=pltpu.CompilerParams(
            dimension_semantics=("parallel", "parallel"),
            vmem_limit_bytes=vmem_limit),
        cost_estimate=pl.CostEstimate(flops=flops, transcendentals=0,
                                      bytes_accessed=bytes_accessed),
    )(a, w_mat, b_row)

    # Strip q/channel padding and the junk columns of the (Ho, Wp) layout.
    out = out_flat[:, :mq, :Cout].reshape(N, Ho, Wp, Cout)[:, :, :Wo, :]
    return out


def conv2d_module_forward(x_nchw, w_oihw, bias, **kwargs):
    """Matches the PyTorch module's forward: NCHW in / NCHW out."""
    x_nhwc = jnp.transpose(x_nchw, (0, 2, 3, 1))
    w_hwio = jnp.transpose(w_oihw, (2, 3, 1, 0))
    out_nhwc = conv2d_pallas(x_nhwc, w_hwio, bias, **kwargs)
    return jnp.transpose(out_nhwc, (0, 3, 1, 2))


# ---------------------------- pure-JAX reference -----------------------------

def conv2d_ref(x_nchw, w_oihw, bias):
    kw = w_oihw.shape[-1]
    pad = (kw - 1) // 2
    out = jax.lax.conv_general_dilated(
        x_nchw, w_oihw, window_strides=(1, 1),
        padding=[(pad, pad), (pad, pad)],
        dimension_numbers=("NCHW", "OIHW", "NCHW"))
    return out + bias[None, :, None, None]


# ----------------------------------- main ------------------------------------

if __name__ == "__main__":
    key = jax.random.PRNGKey(0)
    k_x, k_w, k_b = jax.random.split(key, 3)

    N, Cin, H, W = 2, 4, 16, 16
    Cout, kwidth = 8, 3

    x = jax.random.normal(k_x, (N, Cin, H, W), jnp.float32)
    fan_in = Cin * kwidth * kwidth
    w = (jax.random.normal(k_w, (Cout, Cin, kwidth, kwidth), jnp.float32)
         / np.sqrt(fan_in)).astype(jnp.float32)
    b = 0.1 * jax.random.normal(k_b, (Cout,), jnp.float32)

    out = jax.block_until_ready(conv2d_module_forward(x, w, b))
    ref = jax.block_until_ready(conv2d_ref(x, w, b))

    assert out.shape == ref.shape == (N, Cout, H, W), out.shape
    assert np.all(np.isfinite(np.asarray(out)))
    if not np.allclose(np.asarray(out), np.asarray(ref), rtol=5e-2, atol=5e-2):
        err = float(np.max(np.abs(np.asarray(out) - np.asarray(ref))))
        raise AssertionError(f"Pallas Conv2d mismatch vs JAX reference (max err {err})")

    print("KERNEL_OK")
</pallas_src>

<mosaic_0001>
module attributes {stable_mosaic.version = 11 : i64} {
  func.func @_conv_kernel(%arg0: i32, %arg1: i32, %arg2: memref<1x512x36xf32, #tpu.memory_space<vmem>>, %arg3: memref<1x36x128xbf16, #tpu.memory_space<vmem>>, %arg4: memref<1x128xf32, #tpu.memory_space<vmem>>, %arg5: memref<1x256x128xf32, #tpu.memory_space<vmem>>) attributes {dimension_semantics = [#tpu.dimension_semantics<parallel>, #tpu.dimension_semantics<parallel>], iteration_bounds = array<i64: 2, 2>, scalar_prefetch = 0 : i64, scratch_operands = 0 : i64, tpu.core_type = #tpu.core_type<tc>, window_params = [{transform_indices = @transform_0, window_bounds = array<i64: 1, 512, 36>}, {pipeline_mode = #tpu.pipeline_mode<synchronous>, transform_indices = @transform_1, window_bounds = array<i64: 1, 36, 128>}, {pipeline_mode = #tpu.pipeline_mode<synchronous>, transform_indices = @transform_2, window_bounds = array<i64: 1, 128>}, {transform_indices = @transform_3, window_bounds = array<i64: 1, 256, 128>}]} {
    %c256_i32 = arith.constant 256 : i32
    %0 = arith.muli %arg1, %c256_i32 : i32
    %1 = tpu.assume_multiple %0, 8 : i32
    %c0 = arith.constant 0 : index
    %c0_0 = arith.constant 0 : index
    %2 = vector.load %arg4[%c0, %c0_0] : memref<1x128xf32, #tpu.memory_space<vmem>>, vector<1x128xf32>
    %3 = vector.shape_cast %2 : vector<1x128xf32> to vector<1x128xf32>
    %4 = vector.broadcast %3 : vector<1x128xf32> to vector<256x128xf32>
    %c0_i32 = arith.constant 0 : i32
    %5 = arith.addi %1, %c0_i32 : i32
    %c0_1 = arith.constant 0 : index
    %6 = arith.index_cast %5 : i32 to index
    %c0_2 = arith.constant 0 : index
    %7 = vector.load %arg2[%c0_1, %6, %c0_2] : memref<1x512x36xf32, #tpu.memory_space<vmem>>, vector<1x256x36xf32>
    %8 = vector.shape_cast %7 : vector<1x256x36xf32> to vector<256x36xf32>
    %9 = arith.truncf %8 : vector<256x36xf32> to vector<256x36xbf16>
    %c0_3 = arith.constant 0 : index
    %c0_4 = arith.constant 0 : index
    %c0_5 = arith.constant 0 : index
    %10 = vector.load %arg3[%c0_3, %c0_4, %c0_5] : memref<1x36x128xbf16, #tpu.memory_space<vmem>>, vector<1x36x128xbf16>
    %11 = vector.shape_cast %10 : vector<1x36x128xbf16> to vector<36x128xbf16>
    %cst = arith.constant dense<0.000000e+00> : vector<256x128xf32>
    %12 = tpu.matmul %9, %11, %cst {dimension_numbers = #tpu.dot_dimension_numbers<[1], [0], [0], [1], [0, 0, 1, 1], [], []>} : vector<256x36xbf16>, vector<36x128xbf16>, vector<256x128xf32> -> vector<256x128xf32>
    %13 = arith.addf %4, %12 : vector<256x128xf32>
    %c0_6 = arith.constant 0 : index
    %c0_7 = arith.constant 0 : index
    %c0_8 = arith.constant 0 : index
    %14 = vector.load %arg5[%c0_6, %c0_7, %c0_8] : memref<1x256x128xf32, #tpu.memory_space<vmem>>, vector<1x256x128xf32>
    %15 = vector.shape_cast %14 : vector<1x256x128xf32> to vector<256x128xf32>
    %16 = vector.shape_cast %13 : vector<256x128xf32> to vector<1x256x128xf32>
    tpu.vector_store %arg5[%c0_6, %c0_7, %c0_8], %16 {strides = array<i32>} : memref<1x256x128xf32, #tpu.memory_space<vmem>>, vector<1x256x128xf32>,
    return
  }
  func.func @transform_0(%arg0: i32, %arg1: i32) -> (i32, i32, i32) {
    %c0_i32 = arith.constant 0 : i32
    %c0_i32_0 = arith.constant 0 : i32
    %c0_i32_1 = arith.constant 0 : i32
    return %arg0, %c0_i32, %c0_i32_0 : i32, i32, i32
  }
  func.func @transform_1(%arg0: i32, %arg1: i32) -> (i32, i32, i32) {
    %c0_i32 = arith.constant 0 : i32
    %c0_i32_0 = arith.constant 0 : i32
    %c0_i32_1 = arith.constant 0 : i32
    %c0_i32_2 = arith.constant 0 : i32
    return %c0_i32, %c0_i32_0, %c0_i32_1 : i32, i32, i32
  }
  func.func @transform_2(%arg0: i32, %arg1: i32) -> (i32, i32) {
    %c0_i32 = arith.constant 0 : i32
    %c0_i32_0 = arith.constant 0 : i32
    %c0_i32_1 = arith.constant 0 : i32
    return %c0_i32, %c0_i32_0 : i32, i32
  }
  func.func @transform_3(%arg0: i32, %arg1: i32) -> (i32, i32, i32) {
    %c0_i32 = arith.constant 0 : i32
    %c0_i32_0 = arith.constant 0 : i32
    return %arg0, %arg1, %c0_i32 : i32, i32, i32
  }
}

</mosaic_0001>

<bundles_post_ra>
// kernel: tpu_custom_call.1
= control target key start
LH: loop header
LB: loop body
LE: loop exit
PB: predicated region body
PF: predicated region fallthrough
CT: control target
= control target key end

     0   :  { %8 = vsyncpa [#allocation3], 0  ;;  %s1060_s0 = inlined_call_operand.vmem [shape: f32[2,512,36], index: 0, kind: input, shape index: {}]   ;;  %s1061_s1 = inlined_call_operand.vmem [shape: bf16[1,36,128], index: 1, kind: input, shape index: {}]   ;;  %s1062_s2 = inlined_call_operand.vmem [shape: f32[1,128], index: 2, kind: input, shape index: {}]   ;;  %s1063_s3 = inlined_call_operand.hbm [shape: f32[2,512,128], index: 3, kind: output, shape index: {}]  }
   0x1   :  { %10 = vsyncpa [#allocation3 + $0x1], 0  ;;  %s804_s12 = smov 0   ;;  %s806_s13 = smov 0  }
   0x2   :  { %s808_s14 = smov 0   ;;  %s810_s15 = smov 0  }
   0x3   :  { %s812_s16 = smov 0   ;;  %s814_s17 = smov 0  }
   0x4   :  { %s816_s18 = smov 0   ;;  %s818_s19 = smov 0  }
   0x5 LB: > { %s561_s20 = sadd.s32 4294967295, %s780_s19   ;;  %s562_s21 = sadd.s32 4294967294, %s780_s19   ;;  %s780_s19 = sphi %s818_s19, %s16_s19   ;;  %s776_s18 = sphi %s816_s18, %s1072_s18   ;;  %s772_s17 = sphi %s814_s17, %s1071_s17   ;;  %s768_s16 = sphi %s812_s16, %s1070_s16   ;;  %s764_s15 = sphi %s810_s15, %s1069_s15   ;;  %s760_s14 = sphi %s808_s14, %s1068_s14   ;;  %s756_s13 = sphi %s806_s13, %s1067_s13   ;;  %s752_s12 = sphi %s804_s12, %s1066_s12  }
   0x6   : > { %s25_s22 = sadd.s32 1, %s772_s17  ;;  %s28_s23 = sadd.s32 1, %s776_s18 }
   0x7   : > { %p26_p0 = scmp.ge.s32.totalorder %s25_s22, 2  ;;  %p115_p1 = scmp.ne.s32.totalorder %s760_s14, %s756_s13 }
   0x8   : > { %p116_p2 = scmp.eq.s32.totalorder %s561_s20, 3  ;;  %p121_p5 = scmp.ne.s32.totalorder %s756_s13, %s752_s12 }
   0x9   : > { %s1074_s22 = smov (%p26_p0, %s25_s22), 0  ;;  %s1076_s23 = smov (!%p26_p0, %s28_s23), %s776_s18 }
   0xa   : > { %s101_s24 = ssub.s32 %s772_s17, %s1074_s22  ;;  %p855_p3 = por %p116_p2, %p115_p1 }
   0xb   : > { %p30_p4 = scmp.ge.s32.totalorder %s1076_s23, 2  ;;  %p122_p6 = scmp.eq.s32.totalorder %s562_s21, 3 }
   0xc   : > { %p565_p7 = scmp.ge.s32.totalorder %s780_s19, 1  ;;  %p154_p9 = scmp.lt.s32.totalorder %s780_s19, 5 }
   0xd   : > { %s1078_s23 = smov (%p30_p4, %s1076_s23), 0  ;;  %p864_p8 = por %p122_p6, %p121_p5 }
   0xe   : > { %s100_s27 = ssub.s32 %s776_s18, %s1078_s23  ;;  %s105_s28 = sadd.s32 1, %s760_s14 }
   0xf   : > { %s102_s29 = sor.u32 %s101_s24, %s100_s27  ;;  %p155_p10 = pnand %p565_p7, %p154_p9 }
  0x10   : > { %p103_p11 = scmp.eq.s32.totalorder %s102_s29, 0  ;;  %p178_p12 = scmp.lt.s32.totalorder (!%p155_p10), %s768_s16, 1 }
  0x11   : > { %158 = sbr.rel (%p155_p10) target bundleno = 235 (0xeb), region = 32  ;;  %s569_s7 = sshll.u32 (!%p155_p10), %s764_s15, 8 }
  0x12   : > { %s873_s30 = scalar_select %p103_p11, %s760_s14, %s105_s28  }
  0x13   : > { %s175_s29 = sand.u32 (!%p155_p10), 1, %s756_s13   ;;  %s596_s9 = sshll.u32 (!%p155_p10), %s768_s16, 6 }
  0x14   : > { %s566_s4 = sshll.u32 (!%p155_p10), %s175_s29, 8  ;;  %s466_s27 = scalar_lea.sflag (!%p155_p10), [#allocation3], %s175_s29 }
  0x16   : > { %v243_v0 = vld [vmem:[%s1061_s1 + $0x10] sm:$0x3]  ;;  %vm308_vm0 = vcmask 1041408   ;;  %s179_s6 = scalar_select %p178_p12, %s768_s16, 1  ;;  %v602_v4 = vld [vmem:[%s1061_s1 + $0x8] sm:$0xff]  ;;  %v601_v5 = vld [vmem:[%s1061_s1] sm:$0xff] }
  0x17   : > { %v253_v1 = vunpack.c.l.b16 %v243_v0  ;;  %vm259_vm1 = vcmask 293888   ;;  %v946_v54 = vld [vmem:[%s1062_s2] ss:$0 sm:$0xff] }
  0x18   : > { %s600_s8 = sshll.u32 %s179_s6, 9 }
  0x19   : > { %v256_v2 = vpack.c.b16 %v253_v1, %v253_v1  ;;  %s182_s11 = scalar_lea.vmem %s1060_s0, %s600_s8  ;;  %s595_s8 = sshll.u32 %s764_s15, 5 }
  0x1a   : > { %s887_s24 = scalar_lea.vmem %s182_s11, %s569_s7  ;;  %s950_s7 = scalar_lea.vmem [#allocation2], %s566_s4 }
  0x1b   : > { %v310_v3 = vsel %vm308_vm0, %v256_v2, 0  ;;  %v191_v6 = vld [vmem:[%s887_s24] sm:$0xff]  ;;  %v192_v7 = vld [vmem:[%s887_s24 + $0x8] sm:$0xff]  ;;  %v193_v18 = vld [vmem:[%s887_s24 + $0x10] sm:$0xff]  ;;  %s477_s10 = sadd.s32 %s596_s9, %s595_s8  ;;  %s480_s21 = sshll.u32 %s950_s7, 4  ;;  %s481_s21 = int_to_ptr.vmem [resolvable:$true] %s480_s21 }
  0x1c   : > { %317 = vmatpush.bf16.msra.mxu0 %v310_v3  ;;  %603 = vmatpush.bf16.msra.mxu1 %v310_v3  ;;  %v199_v8 = vld [vmem:[%s887_s24 + $0x40] sm:$0xff]  ;;  %v200_v9 = vld [vmem:[%s887_s24 + $0x48] sm:$0xff]  ;;  %v223_v14 = vpack.c.bf16 %v192_v7, %v191_v6  ;;  %v194_v19 = vld [vmem:[%s887_s24 + $0x18] sm:$0xff]  ;;  %s597_s11 = sshll.u32 %s477_s10, 3  ;;  %s706_s8 = scalar_lea.hbm %s1063_s3, 1024 }
  0x1d   : > { %604 = vmatpush.bf16.msra.mxu2 %v310_v3  ;;  %605 = vmatpush.bf16.msra.mxu3 %v310_v3  ;;  %v207_v10 = vld [vmem:[%s887_s24 + $0x80] sm:$0xff]  ;;  %v208_v11 = vld [vmem:[%s887_s24 + $0x88] sm:$0xff]  ;;  %v227_v15 = vpack.c.bf16 %v200_v9, %v199_v8  ;;  %v201_v20 = vld [vmem:[%s887_s24 + $0x50] sm:$0xff]  ;;  %v224_v26 = vpack.c.bf16 %v194_v19, %v193_v18  ;;  %s479_s20 = scalar_lea.hbm %s1063_s3, %s597_s11 }
  0x1e   : > { %v215_v12 = vld [vmem:[%s887_s24 + $0xc0] sm:$0xff]  ;;  %v216_v13 = vld [vmem:[%s887_s24 + $0xc8] sm:$0xff]  ;;  %v231_v16 = vpack.c.bf16 %v208_v11, %v207_v10  ;;  %v202_v21 = vld [vmem:[%s887_s24 + $0x58] sm:$0xff] }
  0x1f   : > { %v235_v17 = vpack.c.bf16 %v216_v13, %v215_v12  ;;  %v209_v22 = vld [vmem:[%s887_s24 + $0x90] sm:$0xff]  ;;  %v210_v23 = vld [vmem:[%s887_s24 + $0x98] sm:$0xff]  ;;  %v228_v27 = vpack.c.bf16 %v202_v21, %v201_v20  ;;  %v195_v30 = vld [vmem:[%s887_s24 + $0x20] sm:$0xff] }
  0x20   : > { %318 = vmatpush.bf16.msra.mxu0 %v602_v4  ;;  %606 = vmatpush.bf16.msra.mxu1 %v602_v4  ;;  %v217_v24 = vld [vmem:[%s887_s24 + $0xd0] sm:$0xff]  ;;  %v218_v25 = vld [vmem:[%s887_s24 + $0xd8] sm:$0xff]  ;;  %v232_v28 = vpack.c.bf16 %v210_v23, %v209_v22  ;;  %v196_v31 = vld [vmem:[%s887_s24 + $0x28] sm:$0xff] }
  0x21   : > { %607 = vmatpush.bf16.msra.mxu2 %v602_v4  ;;  %608 = vmatpush.bf16.msra.mxu3 %v602_v4  ;;  %v236_v29 = vpack.c.bf16 %v218_v25, %v217_v24  ;;  %v203_v32 = vld [vmem:[%s887_s24 + $0x60] sm:$0xff]  ;;  %v204_v33 = vld [vmem:[%s887_s24 + $0x68] sm:$0xff]  ;;  %v225_v38 = vpack.c.bf16 %v196_v31, %v195_v30  ;;  %v197_v42 = vld [vmem:[%s887_s24 + $0x30] sm:$0xff] }
  0x22   : > { %v211_v34 = vld [vmem:[%s887_s24 + $0xa0] sm:$0xff]  ;;  %v212_v35 = vld [vmem:[%s887_s24 + $0xa8] sm:$0xff]  ;;  %v229_v39 = vpack.c.bf16 %v204_v33, %v203_v32  ;;  %v198_v43 = vld [vmem:[%s887_s24 + $0x38] sm:$0xff] }
  0x23   : > { %v219_v36 = vld [vmem:[%s887_s24 + $0xe0] sm:$0xff]  ;;  %v220_v37 = vld [vmem:[%s887_s24 + $0xe8] sm:$0xff]  ;;  %v233_v40 = vpack.c.bf16 %v212_v35, %v211_v34  ;;  %v205_v44 = vld [vmem:[%s887_s24 + $0x70] sm:$0xff]  ;;  %v226_v50 = vpack.c.bf16 %v198_v43, %v197_v42 }
  0x24   : > { %319 = vmatpush.bf16.msra.mxu0 %v601_v5  ;;  %609 = vmatpush.bf16.msra.mxu1 %v601_v5  ;;  %v237_v41 = vpack.c.bf16 %v220_v37, %v219_v36  ;;  %v206_v45 = vld [vmem:[%s887_s24 + $0x78] sm:$0xff]  ;;  %v213_v46 = vld [vmem:[%s887_s24 + $0xb0] sm:$0xff] }
  0x25   : > { %610 = vmatpush.bf16.msra.mxu2 %v601_v5  ;;  %611 = vmatpush.bf16.msra.mxu3 %v601_v5  ;;  %v214_v47 = vld [vmem:[%s887_s24 + $0xb8] sm:$0xff]  ;;  %v221_v48 = vld [vmem:[%s887_s24 + $0xf0] sm:$0xff]  ;;  %v230_v51 = vpack.c.bf16 %v206_v45, %v205_v44 }
  0x26   : > { %v222_v49 = vld [vmem:[%s887_s24 + $0xf8] sm:$0xff]  ;;  %v234_v52 = vpack.c.bf16 %v214_v47, %v213_v46  ;;  %s482_s24 = sshll.u32 %s479_s20, 4  ;;  %s483_s24 = int_to_ptr.hbm [resolvable:$true] %s482_s24 }
  0x27   : > { %578 = vmatmul.msk.bf16.vlgmr.msra.gmra.mxu0 %vm259_vm1, %v223_v14  ;;  %582 = vmatmul.msk.bf16.vlgmr.msra.gmra.mxu1 %vm259_vm1, %v227_v15  ;;  %v238_v53 = vpack.c.bf16 %v222_v49, %v221_v48  ;;  %s700_s28 = sshra.s32 %s483_s24, 4  ;;  %s701_s28 = int_to_ptr.hbm [resolvable:$true] %s700_s28 }
  0x28   : > { %586 = vmatmul.msk.bf16.vlgmr.msra.gmra.mxu2 %vm259_vm1, %v231_v16  ;;  %590 = vmatmul.msk.bf16.vlgmr.msra.gmra.mxu3 %vm259_vm1, %v235_v17  ;;  %s702_s4 = scalar_lea.hbm %s701_s28, 256  ;;  %p707_p2 = scmp.lt.s32.totalorder %s701_s28, %s1063_s3 }
  0x29   : > { %p703_p13 = scmp.ne.s32.totalorder %s701_s28, %s702_s4  ;;  %p708_p4 = scmp.lt.s32.totalorder %s706_s8, %s702_s4 }
  0x2b   : > { %p704_p0 = pnand %p703_p13, %p855_p3  ;;  %p709_p5 = por %p708_p4, %p707_p2 }
  0x2d   : > { %p705_p1 = pneg %p704_p0 }
  0x2f   : > { %p710_p6 = pnand %p709_p5, %p705_p1 }
  0x37   : > { %579 = vmatmul.msk.bf16.gmra.mxu0 %vm259_vm1, %v224_v26  ;;  %583 = vmatmul.msk.bf16.gmra.mxu1 %vm259_vm1, %v228_v27 }
  0x38   : > { %587 = vmatmul.msk.bf16.gmra.mxu2 %vm259_vm1, %v232_v28  ;;  %591 = vmatmul.msk.bf16.gmra.mxu3 %vm259_vm1, %v236_v29 }
  0x47   : > { %580 = vmatmul.msk.bf16.gmra.mxu0 %vm259_vm1, %v225_v38  ;;  %584 = vmatmul.msk.bf16.gmra.mxu1 %vm259_vm1, %v229_v39 }
  0x48   : > { %588 = vmatmul.msk.bf16.gmra.mxu2 %vm259_vm1, %v233_v40  ;;  %592 = vmatmul.msk.bf16.gmra.mxu3 %vm259_vm1, %v237_v41 }
  0x57   : > { %581 = vmatmul.msk.bf16.gmra.mxu0 %vm259_vm1, %v226_v50  ;;  %585 = vmatmul.msk.bf16.gmra.mxu1 %vm259_vm1, %v230_v51 }
  0x58   : > { %589 = vmatmul.msk.bf16.gmra.mxu2 %vm259_vm1, %v234_v52  ;;  %593 = vmatmul.msk.bf16.gmra.mxu3 %vm259_vm1, %v238_v53 }
  0xa4   : > { %v321_v55 = vpop.f32.mrf.mxu0  ;;  %v341_v56 = vpop.f32.mrf.mxu1 }
  0xa5   : > { %v401_v57 = vadd.f32 %v946_v54, %v321_v55  ;;  %v409_v58 = vadd.f32 %v946_v54, %v341_v56 }
  0xa7   : > { %433 = vst [vmem:[%s950_s7] sm:$0xff] %v401_v57 }
  0xa8   : > { %441 = vst [vmem:[%s950_s7 + $0x40] sm:$0xff] %v409_v58 }
  0xab   : > { %v361_v59 = vpop.f32.mrf.mxu2  ;;  %v381_v60 = vpop.f32.mrf.mxu3 }
  0xac   : > { %v417_v61 = vadd.f32 %v946_v54, %v361_v59  ;;  %v425_v62 = vadd.f32 %v946_v54, %v381_v60  ;;  %v323_v63 = vpop.f32.mrf.mxu0  ;;  %v343_v0 = vpop.f32.mrf.mxu1 }
  0xad   : > { %v402_v1 = vadd.f32 %v946_v54, %v323_v63  ;;  %v410_v2 = vadd.f32 %v946_v54, %v343_v0 }
  0xae   : > { %449 = vst [vmem:[%s950_s7 + $0x80] sm:$0xff] %v417_v61 }
  0xaf   : > { %457 = vst [vmem:[%s950_s7 + $0xc0] sm:$0xff] %v425_v62 }
  0xb0   : > { %434 = vst [vmem:[%s950_s7 + $0x8] sm:$0xff] %v402_v1 }
  0xb1   : > { %442 = vst [vmem:[%s950_s7 + $0x48] sm:$0xff] %v410_v2 }
  0xb3   : > { %v363_v3 = vpop.f32.mrf.mxu2  ;;  %v383_v4 = vpop.f32.mrf.mxu3 }
  0xb4   : > { %v418_v5 = vadd.f32 %v946_v54, %v363_v3  ;;  %v426_v6 = vadd.f32 %v946_v54, %v383_v4  ;;  %v326_v7 = vpop.f32.mrf.mxu0  ;;  %v346_v8 = vpop.f32.mrf.mxu1 }
  0xb5   : > { %v403_v9 = vadd.f32 %v946_v54, %v326_v7  ;;  %v411_v10 = vadd.f32 %v946_v54, %v346_v8 }
  0xb6   : > { %450 = vst [vmem:[%s950_s7 + $0x88] sm:$0xff] %v418_v5 }
  0xb7   : > { %458 = vst [vmem:[%s950_s7 + $0xc8] sm:$0xff] %v426_v6 }
  0xb8   : > { %435 = vst [vmem:[%s950_s7 + $0x10] sm:$0xff] %v403_v9 }
  0xb9   : > { %443 = vst [vmem:[%s950_s7 + $0x50] sm:$0xff] %v411_v10 }
  0xbb   : > { %v366_v11 = vpop.f32.mrf.mxu2  ;;  %v386_v12 = vpop.f32.mrf.mxu3 }
  0xbc   : > { %v419_v13 = vadd.f32 %v946_v54, %v366_v11  ;;  %v427_v14 = vadd.f32 %v946_v54, %v386_v12  ;;  %v328_v15 = vpop.f32.mrf.mxu0  ;;  %v348_v16 = vpop.f32.mrf.mxu1 }
  0xbd   : > { %v404_v17 = vadd.f32 %v946_v54, %v328_v15  ;;  %v412_v18 = vadd.f32 %v946_v54, %v348_v16 }
  0xbe   : > { %451 = vst [vmem:[%s950_s7 + $0x90] sm:$0xff] %v419_v13 }
  0xbf   : > { %459 = vst [vmem:[%s950_s7 + $0xd0] sm:$0xff] %v427_v14 }
  0xc0   : > { %436 = vst [vmem:[%s950_s7 + $0x18] sm:$0xff] %v404_v17 }
  0xc1   : > { %444 = vst [vmem:[%s950_s7 + $0x58] sm:$0xff] %v412_v18 }
  0xc3   : > { %v368_v19 = vpop.f32.mrf.mxu2  ;;  %v388_v20 = vpop.f32.mrf.mxu3 }
  0xc4   : > { %v420_v21 = vadd.f32 %v946_v54, %v368_v19  ;;  %v428_v22 = vadd.f32 %v946_v54, %v388_v20  ;;  %v331_v23 = vpop.f32.mrf.mxu0  ;;  %v351_v24 = vpop.f32.mrf.mxu1 }
  0xc5   : > { %v405_v25 = vadd.f32 %v946_v54, %v331_v23  ;;  %v413_v26 = vadd.f32 %v946_v54, %v351_v24 }
  0xc6   : > { %452 = vst [vmem:[%s950_s7 + $0x98] sm:$0xff] %v420_v21 }
  0xc7   : > { %460 = vst [vmem:[%s950_s7 + $0xd8] sm:$0xff] %v428_v22 }
  0xc8   : > { %437 = vst [vmem:[%s950_s7 + $0x20] sm:$0xff] %v405_v25 }
  0xc9   : > { %445 = vst [vmem:[%s950_s7 + $0x60] sm:$0xff] %v413_v26 }
  0xcb   : > { %v371_v27 = vpop.f32.mrf.mxu2  ;;  %v391_v28 = vpop.f32.mrf.mxu3 }
  0xcc   : > { %v421_v29 = vadd.f32 %v946_v54, %v371_v27  ;;  %v429_v30 = vadd.f32 %v946_v54, %v391_v28  ;;  %v333_v31 = vpop.f32.mrf.mxu0  ;;  %v353_v32 = vpop.f32.mrf.mxu1 }
  0xcd   : > { %v406_v33 = vadd.f32 %v946_v54, %v333_v31  ;;  %v414_v34 = vadd.f32 %v946_v54, %v353_v32 }
  0xce   : > { %453 = vst [vmem:[%s950_s7 + $0xa0] sm:$0xff] %v421_v29 }
  0xcf   : > { %461 = vst [vmem:[%s950_s7 + $0xe0] sm:$0xff] %v429_v30 }
  0xd0   : > { %438 = vst [vmem:[%s950_s7 + $0x28] sm:$0xff] %v406_v33 }
  0xd1   : > { %446 = vst [vmem:[%s950_s7 + $0x68] sm:$0xff] %v414_v34 }
  0xd3   : > { %v373_v35 = vpop.f32.mrf.mxu2  ;;  %v393_v36 = vpop.f32.mrf.mxu3 }
  0xd4   : > { %v422_v37 = vadd.f32 %v946_v54, %v373_v35  ;;  %v430_v38 = vadd.f32 %v946_v54, %v393_v36  ;;  %v336_v39 = vpop.f32.mrf.mxu0  ;;  %v356_v40 = vpop.f32.mrf.mxu1 }
  0xd5   : > { %v407_v41 = vadd.f32 %v946_v54, %v336_v39  ;;  %v415_v42 = vadd.f32 %v946_v54, %v356_v40 }
  0xd6   : > { %454 = vst [vmem:[%s950_s7 + $0xa8] sm:$0xff] %v422_v37 }
  0xd7   : > { %462 = vst [vmem:[%s950_s7 + $0xe8] sm:$0xff] %v430_v38 }
  0xd8   : > { %439 = vst [vmem:[%s950_s7 + $0x30] sm:$0xff] %v407_v41 }
  0xd9   : > { %447 = vst [vmem:[%s950_s7 + $0x70] sm:$0xff] %v415_v42 }
  0xdb   : > { %v376_v43 = vpop.f32.mrf.mxu2  ;;  %v396_v44 = vpop.f32.mrf.mxu3 }
  0xdc   : > { %v423_v45 = vadd.f32 %v946_v54, %v376_v43  ;;  %v431_v46 = vadd.f32 %v946_v54, %v396_v44  ;;  %v338_v47 = vpop.f32.mrf.mxu0  ;;  %v358_v48 = vpop.f32.mrf.mxu1 }
  0xdd   : > { %v408_v49 = vadd.f32 %v946_v54, %v338_v47  ;;  %v416_v50 = vadd.f32 %v946_v54, %v358_v48 }
  0xde   : > { %455 = vst [vmem:[%s950_s7 + $0xb0] sm:$0xff] %v423_v45 }
  0xdf   : > { %463 = vst [vmem:[%s950_s7 + $0xf0] sm:$0xff] %v431_v46 }
  0xe0   : > { %440 = vst [vmem:[%s950_s7 + $0x38] sm:$0xff] %v408_v49 }
  0xe1   : > { %448 = vst [vmem:[%s950_s7 + $0x78] sm:$0xff] %v416_v50 }
  0xe3   : > { %v378_v51 = vpop.f32.mrf.mxu2  ;;  %v398_v52 = vpop.f32.mrf.mxu3 }
  0xe4   : > { %v424_v53 = vadd.f32 %v946_v54, %v378_v51  ;;  %v432_v55 = vadd.f32 %v946_v54, %v398_v52 }
  0xe6   : > { %456 = vst [vmem:[%s950_s7 + $0xb8] sm:$0xff] %v424_v53 }
  0xe7   : > { %464 = vst [vmem:[%s950_s7 + $0xf8] sm:$0xff] %v432_v55 }
  0xe8   : > { %713 = shalt.err (!%p710_p6)
}
  0xe9   : > { %s782_s29 = smov 128   ;;  %s783_s7 = smov 8  }
  0xea   : > { %612 = dma.vmem_to_hbm [thread:$0]  (%p855_p3), %s481_s21, 4096, %s483_s24, %s466_s27, %s782_s29, %s782_s29, %s783_s7  }
  0xeb PF: > { %p618_p7 = scmp.ge.s32.totalorder %s780_s19, 2  ;;  %s497_s11 = sand.u32 1, %s752_s12  }
  0xec   : > { %s498_s15 = scalar_lea.sflag [#allocation3], %s497_s11 }
  0xed   : > { %p615_p9 = pnand %p618_p7, %p864_p8 }
  0xef   : > { %p616_p10 = pneg %p615_p9 }
  0xf1   : > { %747 = dma.done.wait (%p616_p10), %s498_s15, 4096  }
  0xf2   : > { %749 = vsyncadd (%p616_p10), %s498_s15, 4294963200  ;;  %s16_s19 = sadd.s32 1, %s780_s19   ;;  %s1066_s12 = smov %s756_s13 }
  0xf3   : > { %p13_p11 = scmp.ge.s32.totalorder %s16_s19, 6   ;;  %s1067_s13 = smov %s760_s14 }
  0xf4   : > { %s1068_s14 = smov %s873_s30  ;;  %s1069_s15 = smov %s772_s17 }
  0xf5   : > { %s1070_s16 = smov %s776_s18  ;;  %s1071_s17 = smov %s1074_s22 }
  0xf6   : > { %s1072_s18 = smov %s1078_s23  ;;  %15 = sbr.rel (!%p13_p11) target bundleno = 5 (0x5), region = 68 }
  0xfb   :  { %504 = vsyncpa [#allocation3], 1 }
  0xfc   :  { %506 = vsyncpa [#allocation3 + $0x1], 1 }

</bundles_post_ra>
